<compile_context>
chip_gen: v5e
topology: v5e:2x2
jax: 0.10.0
libtpu: 0.0.40
codegen_flags: <defaults>
</compile_context>

<pallas_src>
import jax
import jax.numpy as jnp
from jax import lax
from jax.experimental import pallas as pl
from jax.experimental.pallas import tpu as pltpu

PATCH = 4
DIM = 32            # in_ch == dim is required for the 'pool' branch
EPS = 1e-5


def patch_embed_kernel(x_ref, gamma_ref, beta_ref, o_ref):
    # x_ref:     (TR*P, Ww, P*C)  image rows x patch-cols x (P cols * C channels)
    # gamma_ref: (1, 1, P*C)      gamma tiled P times along lanes (resident)
    # beta_ref:  (1, 1, P*C)
    # o_ref:     (TR, Ww, C)
    tr, ww, c = o_ref.shape
    pc = x_ref.shape[-1]
    p = pc // c

    x = x_ref[...].astype(jnp.float32)            # (tr*p, ww, pc)
    x4 = x.reshape(tr, p, ww, pc)                 # split image rows -> (patch row, in-patch row)

    # Pool across the P rows of each patch: single pass for both max and sum (VPU).
    rmax = x4[:, 0]
    rsum = x4[:, 0]
    for k in range(1, p):
        xk = x4[:, k]
        rmax = jnp.maximum(rmax, xk)
        rsum = rsum + xk

    def lane_coset_reduce(v, op):
        # Reduce over lanes {l, l+c, l+2c, ...} (the P patch columns of each
        # channel).  Afterwards every c-lane group holds identical values.
        if p == 1:
            return v
        if (p & (p - 1)) == 0:                    # power of two: log2(p) rolls (XLU)
            out = v
            shift = c
            while shift < pc:
                out = op(out, pltpu.roll(out, shift=shift, axis=2))
                shift *= 2
            return out
        out = v                                   # general fallback: p-1 rolls
        for k in range(1, p):
            out = op(out, pltpu.roll(v, shift=k * c, axis=2))
        return out

    cmax = lane_coset_reduce(rmax, jnp.maximum)
    csum = lane_coset_reduce(rsum, jnp.add)
    # 0.5 * (MaxPool + AvgPool), fused: avg = sum / P^2 (zero padding included,
    # matching F.pad + AvgPool2d(count_include_pad=True)).
    pooled = 0.5 * cmax + (0.5 / (p * p)) * csum  # (tr, ww, pc)

    # LayerNorm over channels.  Each channel appears exactly p times per lane
    # row, so the mean/var over all pc lanes equal the per-channel mean/var.
    mu = jnp.mean(pooled, axis=-1, keepdims=True)
    var = jnp.mean(jnp.square(pooled - mu), axis=-1, keepdims=True)
    y = (pooled - mu) * lax.rsqrt(var + EPS)
    y = y * gamma_ref[...] + beta_ref[...]        # (1,1,pc) broadcast, block-resident

    o_ref[...] = y[:, :, :c].astype(o_ref.dtype)  # first copy of the channels


def _choose_tile_rows(n_patch_rows, ww, pc, itemsize, patch,
                      target_patches=1024, max_block_bytes=2 << 20):
    """Patch rows per grid step: ~target_patches patches, capped by VMEM block budget."""
    row_bytes = patch * ww * pc * itemsize          # one patch row of input
    tr_cap = max(1, max_block_bytes // row_bytes)
    tr = -(-target_patches // max(ww, 1))           # ceil
    return int(max(1, min(tr, tr_cap, n_patch_rows)))


def patch_embed(x, gamma, beta, patch_size=PATCH, target_patches_per_tile=1024):
    """x: (B, C, H, W) NCHW; returns (B, C, Hh, Ww)."""
    B, C, H, W = x.shape
    P = patch_size
    pad_h = (-H) % P
    pad_w = (-W) % P
    if pad_h or pad_w:                              # F.pad equivalent (zeros, bottom/right)
        x = jnp.pad(x, ((0, 0), (0, 0), (0, pad_h), (0, pad_w)))
    H2, W2 = H + pad_h, W + pad_w
    Hh, Ww = H2 // P, W2 // P
    PC = P * C
    Nr = B * Hh                                     # total patch rows

    # Single layout pass: NCHW -> NHWC.  The reshape is a free row-major view
    # (W2*C regrouped as Ww x (P*C)); no extra HBM traffic.
    xv = x.transpose(0, 2, 3, 1).reshape(B * H2, Ww, PC)

    itemsize = jnp.dtype(x.dtype).itemsize
    TR = _choose_tile_rows(Nr, Ww, PC, itemsize, P, target_patches_per_tile)
    grid = (pl.cdiv(Nr, TR),)                       # no divisibility requirement

    gamma_t = jnp.tile(gamma.astype(jnp.float32).reshape(1, 1, C), (1, 1, P))
    beta_t = jnp.tile(beta.astype(jnp.float32).reshape(1, 1, C), (1, 1, P))

    # VMEM budget: double-buffered input blocks + f32 working values; clamp to
    # a range safe on v7x (64 MiB physical) as well as v5e/v6e (128 MiB).
    in_block_bytes = TR * P * Ww * PC * itemsize
    f32_block_bytes = TR * P * Ww * PC * 4
    vmem_need = 2 * in_block_bytes + 4 * f32_block_bytes + (4 << 20)
    vmem_limit = int(min(48 << 20, max(32 << 20, vmem_need)))

    out = pl.pallas_call(
        patch_embed_kernel,
        out_shape=jax.ShapeDtypeStruct((Nr, Ww, C), x.dtype),
        grid_spec=pltpu.PrefetchScalarGridSpec(
            num_scalar_prefetch=0,
            grid=grid,
            in_specs=[
                pl.BlockSpec((TR * P, Ww, PC), lambda i: (i, 0, 0)),
                pl.BlockSpec((1, 1, PC), lambda i: (0, 0, 0)),
                pl.BlockSpec((1, 1, PC), lambda i: (0, 0, 0)),
            ],
            out_specs=pl.BlockSpec((TR, Ww, C), lambda i: (i, 0, 0)),
        ),
        compiler_params=pltpu.CompilerParams(
            dimension_semantics=("parallel",),      # megacore sharding on v7x
            vmem_limit_bytes=vmem_limit,
        ),
    )(xv, gamma_t, beta_t)

    # (B*Hh, Ww, C) -> (B, C, Hh, Ww): one small transpose over the pooled
    # output (1/P^2 of the input size).
    return out.reshape(B, Hh, Ww, C).transpose(0, 3, 1, 2)


def ref_patch_embed(x, gamma, beta, patch_size=PATCH):
    """Pure-JAX reference mirroring the PyTorch forward."""
    B, C, H, W = x.shape
    pad_w = (-W) % patch_size
    pad_h = (-H) % patch_size
    if pad_w or pad_h:
        x = jnp.pad(x, ((0, 0), (0, 0), (0, pad_h), (0, pad_w)))
    Hh, Ww = x.shape[2] // patch_size, x.shape[3] // patch_size
    xr = x.reshape(B, C, Hh, patch_size, Ww, patch_size)
    pooled = 0.5 * (xr.max(axis=(3, 5)) + xr.mean(axis=(3, 5)))    # (B, C, Hh, Ww)
    t = pooled.transpose(0, 2, 3, 1)                               # (B, Hh, Ww, C)
    mu = t.mean(-1, keepdims=True)
    var = ((t - mu) ** 2).mean(-1, keepdims=True)
    normed = (t - mu) / jnp.sqrt(var + EPS) * gamma + beta
    return normed.transpose(0, 3, 1, 2)


if __name__ == "__main__":
    key = jax.random.PRNGKey(0)
    kx, kx2, kg, kb = jax.random.split(key, 4)

    # LayerNorm affine params (non-trivial to catch gamma/beta plumbing bugs)
    gamma = 1.0 + 0.1 * jax.random.normal(kg, (DIM,), jnp.float32)
    beta = 0.1 * jax.random.normal(kb, (DIM,), jnp.float32)

    # Case 1: spatial dims divisible by the patch size.
    B, C, H, W = 2, DIM, 16, 16
    x = jax.random.normal(kx, (B, C, H, W), dtype=jnp.float32)
    out = jax.block_until_ready(patch_embed(x, gamma, beta))
    ref = ref_patch_embed(x, gamma, beta)
    assert out.shape == (B, DIM, H // PATCH, W // PATCH), out.shape
    assert jnp.allclose(out, ref, atol=1e-4, rtol=1e-4), float(jnp.max(jnp.abs(out - ref)))

    # Case 2: spatial dims that need bottom/right zero padding.
    B2, H3, W3 = 1, 18, 10
    x2 = jax.random.normal(kx2, (B2, DIM, H3, W3), dtype=jnp.float32)
    out2 = jax.block_until_ready(patch_embed(x2, gamma, beta))
    ref2 = ref_patch_embed(x2, gamma, beta)
    assert out2.shape == (B2, DIM, -(-H3 // PATCH), -(-W3 // PATCH)), out2.shape
    assert jnp.allclose(out2, ref2, atol=1e-4, rtol=1e-4), float(jnp.max(jnp.abs(out2 - ref2)))

    print("KERNEL_OK")
</pallas_src>

<mosaic_0001>
module attributes {stable_mosaic.version = 11 : i64} {
  func.func @patch_embed_kernel(%arg0: i32, %arg1: memref<32x4x128xf32, #tpu.memory_space<vmem>>, %arg2: memref<1x1x128xf32, #tpu.memory_space<vmem>>, %arg3: memref<1x1x128xf32, #tpu.memory_space<vmem>>, %arg4: memref<8x4x32xf32, #tpu.memory_space<vmem>>) attributes {dimension_semantics = [#tpu.dimension_semantics<parallel>], iteration_bounds = array<i64: 1>, scalar_prefetch = 0 : i64, scratch_operands = 0 : i64, tpu.core_type = #tpu.core_type<tc>, window_params = [{transform_indices = @transform_0, window_bounds = array<i64: 32, 4, 128>}, {pipeline_mode = #tpu.pipeline_mode<synchronous>, transform_indices = @transform_1, window_bounds = array<i64: 1, 1, 128>}, {pipeline_mode = #tpu.pipeline_mode<synchronous>, transform_indices = @transform_2, window_bounds = array<i64: 1, 1, 128>}, {transform_indices = @transform_3, window_bounds = array<i64: 8, 4, 32>}]} {
    %c0 = arith.constant 0 : index
    %c0_0 = arith.constant 0 : index
    %c0_1 = arith.constant 0 : index
    %0 = vector.load %arg1[%c0, %c0_0, %c0_1] : memref<32x4x128xf32, #tpu.memory_space<vmem>>, vector<32x4x128xf32>
    %1 = vector.shape_cast %0 : vector<32x4x128xf32> to vector<8x4x4x128xf32>
    %2 = vector.extract_strided_slice %1 {offsets = [0, 0, 0, 0], sizes = [8, 1, 4, 128], strides = [1, 1, 1, 1]} : vector<8x4x4x128xf32> to vector<8x1x4x128xf32>
    %3 = vector.shape_cast %2 : vector<8x1x4x128xf32> to vector<8x4x128xf32>
    %4 = vector.extract_strided_slice %1 {offsets = [0, 0, 0, 0], sizes = [8, 1, 4, 128], strides = [1, 1, 1, 1]} : vector<8x4x4x128xf32> to vector<8x1x4x128xf32>
    %5 = vector.shape_cast %4 : vector<8x1x4x128xf32> to vector<8x4x128xf32>
    %6 = vector.extract_strided_slice %1 {offsets = [0, 1, 0, 0], sizes = [8, 1, 4, 128], strides = [1, 1, 1, 1]} : vector<8x4x4x128xf32> to vector<8x1x4x128xf32>
    %7 = vector.shape_cast %6 : vector<8x1x4x128xf32> to vector<8x4x128xf32>
    %8 = arith.maximumf %3, %7 : vector<8x4x128xf32>
    %9 = arith.addf %5, %7 : vector<8x4x128xf32>
    %10 = vector.extract_strided_slice %1 {offsets = [0, 2, 0, 0], sizes = [8, 1, 4, 128], strides = [1, 1, 1, 1]} : vector<8x4x4x128xf32> to vector<8x1x4x128xf32>
    %11 = vector.shape_cast %10 : vector<8x1x4x128xf32> to vector<8x4x128xf32>
    %12 = arith.maximumf %8, %11 : vector<8x4x128xf32>
    %13 = arith.addf %9, %11 : vector<8x4x128xf32>
    %14 = vector.extract_strided_slice %1 {offsets = [0, 3, 0, 0], sizes = [8, 1, 4, 128], strides = [1, 1, 1, 1]} : vector<8x4x4x128xf32> to vector<8x1x4x128xf32>
    %15 = vector.shape_cast %14 : vector<8x1x4x128xf32> to vector<8x4x128xf32>
    %16 = arith.maximumf %12, %15 : vector<8x4x128xf32>
    %17 = arith.addf %13, %15 : vector<8x4x128xf32>
    %c32_i32 = arith.constant 32 : i32
    %18 = tpu.dynamic_rotate %16 by %c32_i32 dim 2 : vector<8x4x128xf32>, i32 -> vector<8x4x128xf32>
    %19 = arith.maximumf %16, %18 : vector<8x4x128xf32>
    %c64_i32 = arith.constant 64 : i32
    %20 = tpu.dynamic_rotate %19 by %c64_i32 dim 2 : vector<8x4x128xf32>, i32 -> vector<8x4x128xf32>
    %21 = arith.maximumf %19, %20 : vector<8x4x128xf32>
    %c32_i32_2 = arith.constant 32 : i32
    %22 = tpu.dynamic_rotate %17 by %c32_i32_2 dim 2 : vector<8x4x128xf32>, i32 -> vector<8x4x128xf32>
    %23 = arith.addf %17, %22 : vector<8x4x128xf32>
    %c64_i32_3 = arith.constant 64 : i32
    %24 = tpu.dynamic_rotate %23 by %c64_i32_3 dim 2 : vector<8x4x128xf32>, i32 -> vector<8x4x128xf32>
    %25 = arith.addf %23, %24 : vector<8x4x128xf32>
    %cst = arith.constant 5.000000e-01 : f32
    %26 = vector.broadcast %cst : f32 to vector<8x4x128xf32>
    %27 = arith.mulf %26, %21 : vector<8x4x128xf32>
    %cst_4 = arith.constant 3.125000e-02 : f32
    %28 = vector.broadcast %cst_4 : f32 to vector<8x4x128xf32>
    %29 = arith.mulf %28, %25 : vector<8x4x128xf32>
    %30 = arith.addf %27, %29 : vector<8x4x128xf32>
    %cst_5 = arith.constant dense<0.000000e+00> : vector<8x4xf32>
    %31 = vector.multi_reduction <add>, %30, %cst_5 [2] : vector<8x4x128xf32> to vector<8x4xf32>
    %32 = vector.shape_cast %31 : vector<8x4xf32> to vector<8x4x1xf32>
    %cst_6 = arith.constant 1.280000e+02 : f32
    %33 = vector.broadcast %cst_6 : f32 to vector<8x4x1xf32>
    %34 = arith.divf %32, %33 : vector<8x4x1xf32>
    %35 = vector.broadcast %34 : vector<8x4x1xf32> to vector<8x4x128xf32>
    %36 = arith.subf %30, %35 : vector<8x4x128xf32>
    %37 = arith.mulf %36, %36 : vector<8x4x128xf32>
    %cst_7 = arith.constant dense<0.000000e+00> : vector<8x4xf32>
    %38 = vector.multi_reduction <add>, %37, %cst_7 [2] : vector<8x4x128xf32> to vector<8x4xf32>
    %39 = vector.shape_cast %38 : vector<8x4xf32> to vector<8x4x1xf32>
    %cst_8 = arith.constant 1.280000e+02 : f32
    %40 = vector.broadcast %cst_8 : f32 to vector<8x4x1xf32>
    %41 = arith.divf %39, %40 : vector<8x4x1xf32>
    %42 = vector.broadcast %34 : vector<8x4x1xf32> to vector<8x4x128xf32>
    %43 = arith.subf %30, %42 : vector<8x4x128xf32>
    %cst_9 = arith.constant 9.99999974E-6 : f32
    %44 = vector.broadcast %cst_9 : f32 to vector<8x4x1xf32>
    %45 = arith.addf %41, %44 : vector<8x4x1xf32>
    %46 = math.rsqrt %45 : vector<8x4x1xf32>
    %47 = vector.broadcast %46 : vector<8x4x1xf32> to vector<8x4x128xf32>
    %48 = arith.mulf %43, %47 : vector<8x4x128xf32>
    %c0_10 = arith.constant 0 : index
    %c0_11 = arith.constant 0 : index
    %c0_12 = arith.constant 0 : index
    %49 = vector.load %arg2[%c0_10, %c0_11, %c0_12] : memref<1x1x128xf32, #tpu.memory_space<vmem>>, vector<1x1x128xf32>
    %50 = vector.broadcast %49 : vector<1x1x128xf32> to vector<8x4x128xf32>
    %51 = arith.mulf %48, %50 : vector<8x4x128xf32>
    %c0_13 = arith.constant 0 : index
    %c0_14 = arith.constant 0 : index
    %c0_15 = arith.constant 0 : index
    %52 = vector.load %arg3[%c0_13, %c0_14, %c0_15] : memref<1x1x128xf32, #tpu.memory_space<vmem>>, vector<1x1x128xf32>
    %53 = vector.broadcast %52 : vector<1x1x128xf32> to vector<8x4x128xf32>
    %54 = arith.addf %51, %53 : vector<8x4x128xf32>
    %55 = vector.extract_strided_slice %54 {offsets = [0, 0, 0], sizes = [8, 4, 32], strides = [1, 1, 1]} : vector<8x4x128xf32> to vector<8x4x32xf32>
    %c0_16 = arith.constant 0 : index
    %c0_17 = arith.constant 0 : index
    %c0_18 = arith.constant 0 : index
    %56 = vector.load %arg4[%c0_16, %c0_17, %c0_18] : memref<8x4x32xf32, #tpu.memory_space<vmem>>, vector<8x4x32xf32>
    tpu.vector_store %arg4[%c0_16, %c0_17, %c0_18], %55 {strides = array<i32>} : memref<8x4x32xf32, #tpu.memory_space<vmem>>, vector<8x4x32xf32>,
    return
  }
  func.func @transform_0(%arg0: i32) -> (i32, i32, i32) {
    %c0_i32 = arith.constant 0 : i32
    %c0_i32_0 = arith.constant 0 : i32
    %c0_i32_1 = arith.constant 0 : i32
    return %arg0, %c0_i32, %c0_i32_0 : i32, i32, i32
  }
  func.func @transform_1(%arg0: i32) -> (i32, i32, i32) {
    %c0_i32 = arith.constant 0 : i32
    %c0_i32_0 = arith.constant 0 : i32
    %c0_i32_1 = arith.constant 0 : i32
    %c0_i32_2 = arith.constant 0 : i32
    return %c0_i32, %c0_i32_0, %c0_i32_1 : i32, i32, i32
  }
  func.func @transform_2(%arg0: i32) -> (i32, i32, i32) {
    %c0_i32 = arith.constant 0 : i32
    %c0_i32_0 = arith.constant 0 : i32
    %c0_i32_1 = arith.constant 0 : i32
    %c0_i32_2 = arith.constant 0 : i32
    return %c0_i32, %c0_i32_0, %c0_i32_1 : i32, i32, i32
  }
  func.func @transform_3(%arg0: i32) -> (i32, i32, i32) {
    %c0_i32 = arith.constant 0 : i32
    %c0_i32_0 = arith.constant 0 : i32
    %c0_i32_1 = arith.constant 0 : i32
    return %arg0, %c0_i32, %c0_i32_0 : i32, i32, i32
  }
}

</mosaic_0001>

<bundles_post_ra>
// kernel: tpu_custom_call.1
= control target key start
LH: loop header
LB: loop body
LE: loop exit
PB: predicated region body
PF: predicated region fallthrough
CT: control target
= control target key end

     0   :  { %8 = vsyncpa [#allocation3], 0  ;;  %s867_s0 = inlined_call_operand.hbm [shape: f32[32,4,128], index: 0, kind: input, shape index: {}]   ;;  %s868_s1 = inlined_call_operand.hbm [shape: f32[1,1,128], index: 1, kind: input, shape index: {}]   ;;  %s869_s2 = inlined_call_operand.vmem [shape: f32[1,1,128], index: 2, kind: input, shape index: {}]   ;;  %s870_s3 = inlined_call_operand.hbm [shape: f32[8,4,32], index: 3, kind: output, shape index: {}]  }
   0x1   :  { %9 = vsyncpa [#allocation6], 0 }
   0x2   :  { %10 = vsyncpa [#allocation4], 0  ;;  %s15_s14 = sshll.u32 %s867_s0, 4  ;;  %s587_s15 = smov [#allocation2]   ;;  %s16_s14 = int_to_ptr.hbm [resolvable:$true] %s15_s14 }
   0x3   :  { %s17_s16 = sshll.u32 %s587_s15, 4  ;;  %s29_s19 = sshll.u32 %s868_s1, 4  ;;  %s18_s16 = int_to_ptr.vmem [resolvable:$true] %s17_s16  ;;  %s30_s19 = int_to_ptr.hbm [resolvable:$true] %s29_s19 }
   0x4   :  { %s588_s20 = smov 64   ;;  %s589_s21 = smov 4  }
   0x5   :  { %23 = dma.hbm_to_vmem [thread:$0]  %s16_s14, 2048, %s18_s16, [#allocation3], %s588_s20, %s588_s20, %s589_s21  }
   0x6   :  { %s590_s22 = smov [#allocation5]  }
   0x7   :  { %s31_s23 = sshll.u32 %s590_s22, 4  ;;  %s32_s23 = int_to_ptr.vmem [resolvable:$true] %s31_s23 }
   0x8   :  { %34 = dma.hbm_to_vmem [thread:$0]  %s30_s19, 16, %s32_s23, [#allocation6]  }
   0x9   :  { %581 = dma.done.wait [#allocation3], 2048  }
   0xa   :  { %582 = vsyncadd [#allocation3], 4294965248 }
   0xb   :  { %583 = dma.done.wait [#allocation6], 16  }
   0xc   :  { %584 = vsyncadd [#allocation6], 4294967280  ;;  %v53_v0 = vld [vmem:[#allocation2 + $0x20] sm:$0xf]  ;;  %v54_v1 = vld [vmem:[#allocation2 + $0x24] sm:$0xf] }
   0xd   :  { %v623_v2 = vld [vmem:[#allocation2 + $0x28] sm:$0xf]  ;;  %v79_v3 = vmax.f32 %v53_v0, %v54_v1  ;;  %v45_v4 = vld [vmem:[#allocation2] sm:$0xf]  ;;  %v46_v5 = vld [vmem:[#allocation2 + $0x4] sm:$0xf]  ;;  %v87_v55 = vadd.f32 %v54_v1, %v53_v0 }
   0xe   :  { %v625_v6 = vld [vmem:[#allocation2 + $0x2c] sm:$0xf]  ;;  %v47_v7 = vld [vmem:[#allocation2 + $0x8] sm:$0xf]  ;;  %v77_v8 = vmax.f32 %v45_v4, %v46_v5  ;;  %v627_v9 = vld [vmem:[#allocation2 + $0x30] sm:$0xf]  ;;  %v85_v53 = vadd.f32 %v46_v5, %v45_v4 }
   0xf   :  { %v95_v10 = vmax.f32 %v79_v3, %v623_v2  ;;  %v48_v11 = vld [vmem:[#allocation2 + $0xc] sm:$0xf]  ;;  %v58_v12 = vld [vmem:[#allocation2 + $0x34] sm:$0xf]  ;;  %v630_v14 = vld [vmem:[#allocation2 + $0x38] sm:$0xf]  ;;  %v103_v60 = vadd.f32 %v87_v55, %v623_v2 }
  0x10   :  { %v93_v13 = vmax.f32 %v77_v8, %v47_v7  ;;  %v80_v15 = vmax.f32 %v627_v9, %v58_v12  ;;  %v49_v16 = vld [vmem:[#allocation2 + $0x10] sm:$0xf]  ;;  %v50_v17 = vld [vmem:[#allocation2 + $0x14] sm:$0xf]  ;;  %v51_v19 = vld [vmem:[#allocation2 + $0x18] sm:$0xf]  ;;  %v101_v59 = vadd.f32 %v85_v53, %v47_v7  ;;  %v88_v63 = vadd.f32 %v58_v12, %v627_v9 }
  0x11   :  { %v634_v18 = vmax.f32 %v95_v10, %v625_v6  ;;  %v78_v20 = vmax.f32 %v49_v16, %v50_v17  ;;  %v60_v22 = vld [vmem:[#allocation2 + $0x3c] sm:$0xf]  ;;  %v61_v23 = vld [vmem:[#allocation2 + $0x40] sm:$0xf]  ;;  %s591_s0 = smov 32   ;;  %v86_v58 = vadd.f32 %v50_v17, %v49_v16  ;;  %v119_v3 = vadd.f32 %v103_v60, %v625_v6  ;;  %s468_s28 = sshll.u32 %s870_s3, 4  ;;  %s469_s28 = int_to_ptr.hbm [resolvable:$true] %s468_s28 }
  0x12   :  { %v636_v21 = vmax.f32 %v93_v13, %v48_v11  ;;  %v96_v24 = vmax.f32 %v80_v15, %v630_v14  ;;  %v52_v25 = vld [vmem:[#allocation2 + $0x1c] sm:$0xf]  ;;  %v69_v26 = vld [vmem:[#allocation2 + $0x60] sm:$0xf]  ;;  %v62_v27 = vld [vmem:[#allocation2 + $0x44] sm:$0xf]  ;;  %v117_v62 = vadd.f32 %v101_v59, %v48_v11  ;;  %v104_v5 = vadd.f32 %v88_v63, %v630_v14 }
  0x13   :  { %129 = vrot.lane.b32.xlu1 %v634_v18, %s591_s0  ;;  %v63_v28 = vld [vmem:[#allocation2 + $0x48] sm:$0xf]  ;;  %v94_v29 = vmax.f32 %v78_v20, %v51_v19  ;;  %v70_v30 = vld [vmem:[#allocation2 + $0x64] sm:$0xf]  ;;  %v81_v31 = vmax.f32 %v61_v23, %v62_v27  ;;  %v73_v32 = vld [vmem:[#allocation2 + $0x70] sm:$0xf]  ;;  %v102_v61 = vadd.f32 %v86_v58, %v51_v19  ;;  %v89_v0 = vadd.f32 %v62_v27, %v61_v23 }
  0x14   :  { %125 = vrot.lane.b32.xlu0 %v636_v21, %s591_s0  ;;  %v74_v33 = vld [vmem:[#allocation2 + $0x74] sm:$0xf]  ;;  %v64_v34 = vld [vmem:[#allocation2 + $0x4c] sm:$0xf]  ;;  %v65_v35 = vld [vmem:[#allocation2 + $0x50] sm:$0xf]  ;;  %v643_v39 = vmax.f32 %v96_v24, %v60_v22  ;;  %v83_v43 = vmax.f32 %v69_v26, %v70_v30  ;;  %v120_v8 = vadd.f32 %v104_v5, %v60_v22  ;;  %v91_v10 = vadd.f32 %v70_v30, %v69_v26 }
  0x15   :  { %v66_v36 = vld [vmem:[#allocation2 + $0x54] sm:$0xf]  ;;  %v97_v37 = vmax.f32 %v81_v31, %v63_v28  ;;  %v84_v40 = vmax.f32 %v73_v32, %v74_v33  ;;  %v67_v41 = vld [vmem:[#allocation2 + $0x58] sm:$0xf]  ;;  %v645_v42 = vmax.f32 %v94_v29, %v52_v25  ;;  %v71_v46 = vld [vmem:[#allocation2 + $0x68] sm:$0xf]  ;;  %v118_v1 = vadd.f32 %v102_v61, %v52_v25 }
  0x16   :  { %v82_v38 = vmax.f32 %v65_v35, %v66_v36  ;;  %v75_v45 = vld [vmem:[#allocation2 + $0x78] sm:$0xf]  ;;  %v68_v49 = vld [vmem:[#allocation2 + $0x5c] sm:$0xf]  ;;  %v99_v50 = vmax.f32 %v83_v43, %v71_v46  ;;  %v72_v52 = vld [vmem:[#allocation2 + $0x6c] sm:$0xf]  ;;  %v90_v4 = vadd.f32 %v66_v36, %v65_v35  ;;  %v105_v7 = vadd.f32 %v89_v0, %v63_v28 }
  0x17   :  { %v647_v44 = vmax.f32 %v97_v37, %v64_v34  ;;  %v100_v48 = vmax.f32 %v84_v40, %v75_v45  ;;  %v76_v51 = vld [vmem:[#allocation2 + $0x7c] sm:$0xf]  ;;  %v92_v9 = vadd.f32 %v74_v33, %v73_v32  ;;  %v107_v6 = vadd.f32 %v91_v10, %v71_v46 }
  0x18   :  { %v98_v47 = vmax.f32 %v82_v38, %v67_v41  ;;  %v115_v57 = vmax.f32 %v99_v50, %v72_v52  ;;  %v106_v2 = vadd.f32 %v90_v4, %v67_v41  ;;  %v121_v13 = vadd.f32 %v105_v7, %v64_v34 }
  0x19   :  { %133 = vrot.lane.b32.xlu2 %v647_v44, %s591_s0  ;;  %v116_v56 = vmax.f32 %v100_v48, %v76_v51  ;;  %v108_v12 = vadd.f32 %v92_v9, %v75_v45  ;;  %v123_v14 = vadd.f32 %v107_v6, %v72_v52  ;;  %vm245_vm0 = vcmask 1043456  }
  0x1a   :  { %v114_v54 = vmax.f32 %v98_v47, %v68_v49  ;;  %v122_v11 = vadd.f32 %v106_v2, %v68_v49  ;;  %vm453_vm6 = vcmask 257024  }
  0x1b   :  { %131 = vrot.lane.b32.xlu1 %v643_v39, %s591_s0  ;;  %v124_v15 = vadd.f32 %v108_v12, %v76_v51 }
  0x1c   :  { %127 = vrot.lane.b32.xlu0 %v645_v42, %s591_s0 }
  0x21   :  { %135 = vrot.lane.b32.xlu2 %v114_v54, %s591_s0 }
  0x23   :  { %139 = vrot.lane.b32.xlu1 %v116_v56, %s591_s0 }
  0x24   :  { %137 = vrot.lane.b32.xlu0 %v115_v57, %s591_s0 }
  0x29   :  { %173 = vrot.lane.b32.xlu2 %v117_v62, %s591_s0 }
  0x2b   :  { %177 = vrot.lane.b32.xlu1 %v119_v3, %s591_s0 }
  0x2c   :  { %175 = vrot.lane.b32.xlu0 %v118_v1, %s591_s0 }
  0x31   :  { %179 = vrot.lane.b32.xlu2 %v120_v8, %s591_s0 }
  0x33   :  { %183 = vrot.lane.b32.xlu1 %v122_v11, %s591_s0 }
  0x34   :  { %181 = vrot.lane.b32.xlu0 %v121_v13, %s591_s0 }
  0x39   :  { %185 = vrot.lane.b32.xlu2 %v123_v14, %s591_s0 }
  0x3c   :  { %187 = vrot.lane.b32.xlu0 %v124_v15, %s591_s0 }
  0x73   :  { %v134_v16 = vpop.permute.xlu2 %133 }
  0x74   :  { %v692_v31 = vmax.f32 %v647_v44, %v134_v16 }
  0x7b   :  { %v136_v17 = vpop.permute.xlu2 %135 }
  0x7c   :  { %v677_v24 = vmax.f32 %v114_v54, %v136_v17 }
  0x83   :  { %v174_v26 = vpop.permute.xlu2 %173 }
  0x85   :  { %v130_v19 = vpop.permute.xlu1 %129 }
  0x86   :  { %v143_v20 = vmax.f32 %v634_v18, %v130_v19  ;;  %v126_v22 = vpop.permute.xlu0 %125  ;;  %v189_v18 = vadd.f32 %v174_v26, %v117_v62 }
  0x87   :  { %v672_v23 = vmax.f32 %v636_v21, %v126_v22 }
  0x88   :  { %153 = vrot.lane.b32.xlu0 %v143_v20, %s588_s20 }
  0x89   :  { %149 = vrot.lane.b32.xlu1 %v672_v23, %s588_s20 }
  0x8b   :  { %v180_v33 = vpop.permute.xlu2 %179 }
  0x8c   :  { %v192_v34 = vadd.f32 %v180_v33, %v120_v8 }
  0x8d   :  { %v132_v25 = vpop.permute.xlu1 %131 }
  0x8e   :  { %v680_v27 = vmax.f32 %v643_v39, %v132_v25  ;;  %v128_v28 = vpop.permute.xlu0 %127 }
  0x8f   :  { %v683_v29 = vmax.f32 %v645_v42, %v128_v28 }
  0x90   :  { %159 = vrot.lane.b32.xlu0 %v677_v24, %s588_s20 }
  0x91   :  { %155 = vrot.lane.b32.xlu1 %v680_v27, %s588_s20  ;;  %151 = vrot.lane.b32.xlu2 %v683_v29, %s588_s20 }
  0x93   :  { %v186_v39 = vpop.permute.xlu2 %185 }
  0x94   :  { %v195_v40 = vadd.f32 %v186_v39, %v123_v14 }
  0x95   :  { %v140_v30 = vpop.permute.xlu1 %139 }
  0x96   :  { %v138_v21 = vpop.permute.xlu0 %137  ;;  %v701_v35 = vmax.f32 %v116_v56, %v140_v30 }
  0x97   :  { %v694_v32 = vmax.f32 %v115_v57, %v138_v21 }
  0x98   :  { %197 = vrot.lane.b32.xlu0 %v189_v18, %s588_s20 }
  0x99   :  { %157 = vrot.lane.b32.xlu2 %v692_v31, %s588_s20  ;;  %161 = vrot.lane.b32.xlu1 %v694_v32, %s588_s20 }
  0x9d   :  { %v178_v38 = vpop.permute.xlu1 %177 }
  0x9e   :  { %v176_v36 = vpop.permute.xlu0 %175  ;;  %v191_v41 = vadd.f32 %v178_v38, %v119_v3 }
  0x9f   :  { %v190_v37 = vadd.f32 %v176_v36, %v118_v1 }
  0xa0   :  { %203 = vrot.lane.b32.xlu0 %v192_v34, %s588_s20 }
  0xa1   :  { %163 = vrot.lane.b32.xlu2 %v701_v35, %s588_s20  ;;  %199 = vrot.lane.b32.xlu1 %v190_v37, %s588_s20 }
  0xa5   :  { %v184_v44 = vpop.permute.xlu1 %183 }
  0xa6   :  { %v182_v42 = vpop.permute.xlu0 %181  ;;  %v194_v45 = vadd.f32 %v184_v44, %v122_v11 }
  0xa7   :  { %v193_v43 = vadd.f32 %v182_v42, %v121_v13 }
  0xa8   :  { %209 = vrot.lane.b32.xlu0 %v195_v40, %s588_s20 }
  0xa9   :  { %201 = vrot.lane.b32.xlu2 %v191_v41, %s588_s20  ;;  %205 = vrot.lane.b32.xlu1 %v193_v43, %s588_s20 }
  0xae   :  { %v188_v46 = vpop.permute.xlu0 %187 }
  0xaf   :  { %v710_v47 = vadd.f32 %v188_v46, %v124_v15 }
  0xb1   :  { %207 = vrot.lane.b32.xlu2 %v194_v45, %s588_s20  ;;  %211 = vrot.lane.b32.xlu1 %v710_v47, %s588_s20 }
  0xeb   :  { %v152_v48 = vpop.permute.xlu2 %151 }
  0xec   :  { %v166_v8 = vmax.f32 %v683_v29, %v152_v48 }
  0xee   :  { %v222_v15 = vmul.f32 0.5, %v166_v8 }
  0xf3   :  { %v158_v49 = vpop.permute.xlu2 %157 }
  0xf4   :  { %v169_v26 = vmax.f32 %v692_v31, %v158_v49 }
  0xfa   :  { %v154_v50 = vpop.permute.xlu0 %153 }
  0xfb   :  { %v150_v51 = vpop.permute.xlu1 %149  ;;  %v715_v52 = vpop.permute.xlu2 %163  ;;  %v167_v53 = vmax.f32 %v143_v20, %v154_v50  ;;  %v592_v50 = vmov 128.0  }
  0xfc   :  { %v165_v61 = vmax.f32 %v672_v23, %v150_v51  ;;  %v172_v31 = vmax.f32 %v701_v35, %v715_v52  ;;  %491 = vrcp.f32 %v592_v50 }
  0xfd   :  { %v223_v58 = vmul.f32 0.5, %v167_v53 }
  0xfe   :  { %v221_v0 = vmul.f32 0.5, %v165_v61 }
 0x102   :  { %v160_v54 = vpop.permute.xlu0 %159  ;;  %v492_v51 = vpop.eup %491 }
 0x103   :  { %v156_v55 = vpop.permute.xlu1 %155  ;;  %v202_v56 = vpop.permute.xlu2 %201  ;;  %v170_v20 = vmax.f32 %v677_v24, %v160_v54  ;;  %v225_v24 = vmul.f32 0.5, %v169_v26  ;;  %v271_v35 = vmul.f32 128.0, %v492_v51  ;;  %vm275_vm1 = vweird.f32 %v492_v51 }
 0x104   :  { %v215_v57 = vadd.f32 %v202_v56, %v191_v41  ;;  %v168_v2 = vmax.f32 %v680_v27, %v156_v55 }
 0x105   :  { %v226_v30 = vmul.f32 0.5, %v170_v20  ;;  %v272_v52 = vsub.f32 1.0, %v271_v35 }
 0x106   :  { %v231_v59 = vmul.f32 0.03125, %v215_v57  ;;  %v224_v12 = vmul.f32 0.5, %v168_v2 }
 0x107   :  { %v273_v53 = vmul.f32 %v492_v51, %v272_v52  ;;  %v796_v52 = vld [vmem:[#allocation5] ss:$0 sm:$0xff] }
 0x108   :  { %v717_v60 = vadd.f32 %v231_v59, %v223_v58 }
 0x109   :  { %v274_v54 = vadd.f32 %v492_v51, %v273_v53 }
 0x10a   :  { %v252_v62 = vsel %vm245_vm0, %v717_v60, 0.0  ;;  %v198_v63 = vpop.permute.xlu0 %197 }
 0x10b   :  { %v162_v3 = vpop.permute.xlu1 %161  ;;  %253 = vadd.xlane.f32.xlu1 %v252_v62  ;;  %v213_v4 = vadd.f32 %v198_v63, %v189_v18  ;;  %v208_v11 = vpop.permute.xlu2 %207  ;;  %v740_v55 = vsel %vm275_vm1, %v492_v51, %v274_v54 }
 0x10c   :  { %v218_v16 = vadd.f32 %v208_v11, %v194_v45  ;;  %v171_v23 = vmax.f32 %v694_v32, %v162_v3  ;;  %v228_v45 = vmul.f32 0.5, %v172_v31 }
 0x10d   :  { %v229_v1 = vmul.f32 0.03125, %v213_v4 }
 0x10e   :  { %v234_v27 = vmul.f32 0.03125, %v218_v16 }
 0x10f   :  { %v722_v5 = vadd.f32 %v229_v1, %v221_v0 }
 0x110   :  { %v242_v38 = vadd.f32 %v234_v27, %v226_v30 }
 0x111   :  { %v246_v7 = vsel %vm245_vm0, %v722_v5, 0.0 }
 0x112   :  { %247 = vadd.xlane.f32.xlu2 %v246_v7  ;;  %v204_v10 = vpop.permute.xlu0 %203  ;;  %v261_v42 = vsel %vm245_vm0, %v242_v38, 0.0 }
 0x113   :  { %v200_v13 = vpop.permute.xlu1 %199  ;;  %v216_v9 = vadd.f32 %v204_v10, %v192_v34  ;;  %v227_v34 = vmul.f32 0.5, %v171_v23 }
 0x114   :  { %v214_v6 = vadd.f32 %v200_v13, %v190_v37 }
 0x115   :  { %v232_v14 = vmul.f32 0.03125, %v216_v9 }
 0x116   :  { %v230_v17 = vmul.f32 0.03125, %v214_v6 }
 0x117   :  { %v240_v19 = vadd.f32 %v232_v14, %v224_v12 }
 0x118   :  { %v238_v22 = vadd.f32 %v230_v17, %v222_v15 }
 0x119   :  { %v255_v25 = vsel %vm245_vm0, %v240_v19, 0.0 }
 0x11a   :  { %v249_v28 = vsel %vm245_vm0, %v238_v22, 0.0  ;;  %256 = vadd.xlane.f32.xlu2 %v255_v25  ;;  %v210_v29 = vpop.permute.xlu0 %209 }
 0x11b   :  { %250 = vadd.xlane.f32.xlu0 %v249_v28  ;;  %v206_v18 = vpop.permute.xlu1 %205  ;;  %v219_v21 = vadd.f32 %v210_v29, %v195_v40 }
 0x11c   :  { %v217_v33 = vadd.f32 %v206_v18, %v193_v43 }
 0x11d   :  { %v235_v36 = vmul.f32 0.03125, %v219_v21 }
 0x11e   :  { %v233_v37 = vmul.f32 0.03125, %v217_v33 }
 0x11f   :  { %v243_v32 = vadd.f32 %v235_v36, %v227_v34 }
 0x120   :  { %v241_v39 = vadd.f32 %v233_v37, %v225_v24 }
 0x121   :  { %v264_v41 = vsel %vm245_vm0, %v243_v32, 0.0 }
 0x122   :  { %v258_v44 = vsel %vm245_vm0, %v241_v39, 0.0  ;;  %265 = vadd.xlane.f32.xlu1 %v264_v41 }
 0x123   :  { %v212_v40 = vpop.permute.xlu1 %211  ;;  %262 = vadd.xlane.f32.xlu0 %v261_v42  ;;  %259 = vadd.xlane.f32.xlu2 %v258_v44 }
 0x124   :  { %v220_v43 = vadd.f32 %v212_v40, %v710_v47 }
 0x126   :  { %v236_v46 = vmul.f32 0.03125, %v220_v43 }
 0x128   :  { %v244_v48 = vadd.f32 %v236_v46, %v228_v45 }
 0x12a   :  { %v267_v49 = vsel %vm245_vm0, %v244_v48, 0.0 }
 0x12b   :  { %268 = vadd.xlane.f32.xlu2 %v267_v49 }
 0x17e   :  { %v254_v56 = vpop.xlane.xlu1 %253 }
 0x17f   :  { %v279_v57 = vmul.f32 %v740_v55, %v254_v56  ;;  %v801_v56 = vld [vmem:[%s869_s2] ss:$0 sm:$0xff]  ;;  %s593_s2 = smov [#allocation7]  }
 0x180   :  { %s466_s25 = sshll.u32 %s593_s2, 4  ;;  %s467_s25 = int_to_ptr.vmem [resolvable:$true] %s466_s25 }
 0x181   :  { %v744_v47 = vsub.f32 %v717_v60, %v279_v57 }
 0x183   :  { %v295_v58 = vmul.f32 %v744_v47, %v744_v47 }
 0x185   :  { %v248_v59 = vpop.xlane.xlu2 %247  ;;  %v307_v61 = vsel %vm245_vm0, %v295_v58, 0.0 }
 0x186   :  { %v277_v62 = vmul.f32 %v740_v55, %v248_v59  ;;  %308 = vadd.xlane.f32.xlu2 %v307_v61 }
 0x188   :  { %v751_v63 = vsub.f32 %v722_v5, %v277_v62 }
 0x18a   :  { %v293_v3 = vmul.f32 %v751_v63, %v751_v63 }
 0x18c   :  { %v301_v4 = vsel %vm245_vm0, %v293_v3, 0.0 }
 0x18d   :  { %302 = vadd.xlane.f32.xlu0 %v301_v4  ;;  %v257_v60 = vpop.xlane.xlu2 %256 }
 0x18e   :  { %v280_v0 = vmul.f32 %v740_v55, %v257_v60  ;;  %v251_v1 = vpop.xlane.xlu0 %250 }
 0x18f   :  { %v278_v2 = vmul.f32 %v740_v55, %v251_v1 }
 0x190   :  { %v758_v7 = vsub.f32 %v240_v19, %v280_v0 }
 0x191   :  { %v760_v8 = vsub.f32 %v238_v22, %v278_v2 }
 0x192   :  { %v296_v5 = vmul.f32 %v758_v7, %v758_v7 }
 0x193   :  { %v294_v10 = vmul.f32 %v760_v8, %v760_v8 }
 0x194   :  { %v310_v11 = vsel %vm245_vm0, %v296_v5, 0.0 }
 0x195   :  { %311 = vadd.xlane.f32.xlu0 %v310_v11  ;;  %v266_v13 = vpop.xlane.xlu1 %265  ;;  %v304_v9 = vsel %vm245_vm0, %v294_v10, 0.0 }
 0x196   :  { %v260_v6 = vpop.xlane.xlu2 %259  ;;  %v283_v12 = vmul.f32 %v740_v55, %v266_v13  ;;  %305 = vadd.xlane.f32.xlu1 %v304_v9  ;;  %v263_v14 = vpop.xlane.xlu0 %262 }
 0x197   :  { %v281_v15 = vmul.f32 %v740_v55, %v260_v6  ;;  %v282_v16 = vmul.f32 %v740_v55, %v263_v14 }
 0x198   :  { %v771_v17 = vsub.f32 %v243_v32, %v283_v12 }
 0x199   :  { %v773_v19 = vsub.f32 %v241_v39, %v281_v15  ;;  %v775_v20 = vsub.f32 %v242_v38, %v282_v16 }
 0x19a   :  { %v299_v22 = vmul.f32 %v771_v17, %v771_v17 }
 0x19b   :  { %v297_v23 = vmul.f32 %v773_v19, %v773_v19  ;;  %v298_v25 = vmul.f32 %v775_v20, %v775_v20 }
 0x19c   :  { %v319_v26 = vsel %vm245_vm0, %v299_v22, 0.0 }
 0x19d   :  { %320 = vadd.xlane.f32.xlu0 %v319_v26  ;;  %v313_v27 = vsel %vm245_vm0, %v297_v23, 0.0  ;;  %v316_v28 = vsel %vm245_vm0, %v298_v25, 0.0 }
 0x19e   :  { %v269_v29 = vpop.xlane.xlu2 %268  ;;  %314 = vadd.xlane.f32.xlu1 %v313_v27  ;;  %317 = vadd.xlane.f32.xlu2 %v316_v28 }
 0x19f   :  { %v284_v18 = vmul.f32 %v740_v55, %v269_v29 }
 0x1a1   :  { %v787_v21 = vsub.f32 %v244_v48, %v284_v18 }
 0x1a3   :  { %v300_v30 = vmul.f32 %v787_v21, %v787_v21 }
 0x1a5   :  { %v322_v33 = vsel %vm245_vm0, %v300_v30, 0.0 }
 0x1a6   :  { %323 = vadd.xlane.f32.xlu1 %v322_v33 }
 0x1f9   :  { %v309_v34 = vpop.xlane.xlu2 %308 }
 0x1fa   :  { %v327_v36 = vmul.f32 %v309_v34, %v740_v55 }
 0x1fc   :  { %v335_v24 = vadd.f32 1e-05, %v327_v36 }
 0x1fe   :  { %493 = vrsqrt.f32 %v335_v24  ;;  %vm367_vm3 = vweird.f32 %v335_v24 }
 0x200   :  { %v303_v37 = vpop.xlane.xlu0 %302 }
 0x201   :  { %v325_v38 = vmul.f32 %v303_v37, %v740_v55 }
 0x203   :  { %v333_v32 = vadd.f32 1e-05, %v325_v38 }
 0x204   :  { %v494_v39 = vpop.eup %493 }
 0x205   :  { %v362_v41 = vmul.f32 %v494_v39, %v335_v24  ;;  %495 = vrsqrt.f32 %v333_v32  ;;  %vm368_vm2 = vweird.f32 %v494_v39  ;;  %vm347_vm7 = vweird.f32 %v333_v32 }
 0x206   :  { %vm369_vm4 = vmor %vm367_vm3, %vm368_vm2 }
 0x207   :  { %v363_v31 = vmul.f32 %v494_v39, %v362_v41 }
 0x208   :  { %v312_v42 = vpop.xlane.xlu0 %311 }
 0x209   :  { %v364_v44 = vmul.f32 0.5, %v363_v31  ;;  %v306_v40 = vpop.xlane.xlu1 %305  ;;  %v328_v43 = vmul.f32 %v312_v42, %v740_v55 }
 0x20a   :  { %v326_v45 = vmul.f32 %v306_v40, %v740_v55 }
 0x20b   :  { %v496_v46 = vpop.eup %495  ;;  %v365_v48 = vsub.f32 1.5, %v364_v44  ;;  %v336_v49 = vadd.f32 1e-05, %v328_v43 }
 0x20c   :  { %v342_v50 = vmul.f32 %v496_v46, %v333_v32  ;;  %v334_v51 = vadd.f32 1e-05, %v326_v45  ;;  %vm348_vm5 = vweird.f32 %v496_v46 }
 0x20d   :  { %v366_v35 = vmul.f32 %v494_v39, %v365_v48  ;;  %497 = vrsqrt.f32 %v336_v49  ;;  %vm349_vm8 = vmor %vm347_vm7, %vm348_vm5  ;;  %vm377_vm11 = vweird.f32 %v336_v49 }
 0x20e   :  { %v343_v53 = vmul.f32 %v496_v46, %v342_v50  ;;  %499 = vrsqrt.f32 %v334_v51  ;;  %vm357_vm12 = vweird.f32 %v334_v51 }
 0x20f   :  { %v370_v54 = vsel %vm369_vm4, %v494_v39, %v366_v35 }
 0x210   :  { %v423_v57 = vmul.f32 %v370_v54, %v744_v47  ;;  %v344_v58 = vmul.f32 0.5, %v343_v53  ;;  %v321_v59 = vpop.xlane.xlu0 %320 }
 0x211   :  { %v315_v61 = vpop.xlane.xlu1 %314  ;;  %v318_v62 = vpop.xlane.xlu2 %317  ;;  %v331_v3 = vmul.f32 %v321_v59, %v740_v55 }
 0x212   :  { %v435_v4 = vmul.f32 %v796_v52, %v423_v57  ;;  %v345_v60 = vsub.f32 1.5, %v344_v58  ;;  %v329_v0 = vmul.f32 %v315_v61, %v740_v55  ;;  %v330_v1 = vmul.f32 %v318_v62, %v740_v55 }
 0x213   :  { %v498_v2 = vpop.eup %497  ;;  %v808_v5 = vadd.f32 1e-05, %v331_v3 }
 0x214   :  { %v500_v10 = vpop.eup %499  ;;  %v447_v47 = vadd.f32 %v801_v56, %v435_v4  ;;  %v346_v11 = vmul.f32 %v496_v46, %v345_v60  ;;  %v372_v13 = vmul.f32 %v498_v2, %v336_v49  ;;  %v812_v6 = vadd.f32 1e-05, %v329_v0 }
 0x215   :  { %v352_v9 = vmul.f32 %v500_v10, %v334_v51  ;;  %v814_v12 = vadd.f32 1e-05, %v330_v1  ;;  %501 = vrsqrt.f32 %v808_v5  ;;  %vm378_vm9 = vweird.f32 %v498_v2 }
 0x216   :  { %456 = vst.msk [vmem:[#allocation7 + $0x8] sm:$0xf] %vm453_vm6, %v447_v47  ;;  %v350_v14 = vsel %vm349_vm8, %v496_v46, %v346_v11  ;;  %v373_v15 = vmul.f32 %v498_v2, %v372_v13  ;;  %503 = vrsqrt.f32 %v812_v6  ;;  %vm358_vm10 = vweird.f32 %v500_v10  ;;  %vm379_vm13 = vmor %vm377_vm11, %vm378_vm9 }
 0x217   :  { %v421_v16 = vmul.f32 %v350_v14, %v751_v63  ;;  %v353_v22 = vmul.f32 %v500_v10, %v352_v9  ;;  %505 = vrsqrt.f32 %v814_v12  ;;  %vm359_vm14 = vmor %vm357_vm12, %vm358_vm10  ;;  %vm407_vm2 = vweird.f32 %v808_v5 }
 0x218   :  { %v374_v23 = vmul.f32 0.5, %v373_v15  ;;  %vm387_vm3 = vweird.f32 %v812_v6  ;;  %vm397_vm7 = vweird.f32 %v814_v12 }
 0x219   :  { %v433_v25 = vmul.f32 %v796_v52, %v421_v16  ;;  %v354_v26 = vmul.f32 0.5, %v353_v22  ;;  %v324_v27 = vpop.xlane.xlu1 %323 }
 0x21a   :  { %v375_v28 = vsub.f32 1.5, %v374_v23  ;;  %v332_v29 = vmul.f32 %v324_v27, %v740_v55 }
 0x21b   :  { %v445_v18 = vadd.f32 %v801_v56, %v433_v25  ;;  %v355_v30 = vsub.f32 1.5, %v354_v26  ;;  %v502_v33 = vpop.eup %501 }
 0x21c   :  { %v376_v63 = vmul.f32 %v498_v2, %v375_v28  ;;  %v824_v34 = vadd.f32 1e-05, %v332_v29  ;;  %v504_v36 = vpop.eup %503  ;;  %v402_v37 = vmul.f32 %v502_v33, %v808_v5  ;;  %vm408_vm15 = vweird.f32 %v502_v33 }
 0x21d   :  { %454 = vst.msk [vmem:[#allocation7] sm:$0xf] %vm453_vm6, %v445_v18  ;;  %v356_v24 = vmul.f32 %v500_v10, %v355_v30  ;;  %v506_v38 = vpop.eup %505  ;;  %v382_v32 = vmul.f32 %v504_v36, %v812_v6  ;;  %vm388_vm0 = vweird.f32 %v504_v36  ;;  %vm409_vm4 = vmor %vm407_vm2, %vm408_vm15 }
 0x21e   :  { %v380_v55 = vsel %vm379_vm13, %v498_v2, %v376_v63  ;;  %507 = vrsqrt.f32 %v824_v34  ;;  %v392_v31 = vmul.f32 %v506_v38, %v814_v12  ;;  %v403_v40 = vmul.f32 %v502_v33, %v402_v37  ;;  %vm389_vm5 = vmor %vm387_vm3, %vm388_vm0 }
 0x21f   :  { %v360_v39 = vsel %vm359_vm14, %v500_v10, %v356_v24  ;;  %v424_v41 = vmul.f32 %v380_v55, %v758_v7  ;;  %v383_v44 = vmul.f32 %v504_v36, %v382_v32  ;;  %vm398_vm1 = vweird.f32 %v506_v38 }
 0x220   :  { %v422_v42 = vmul.f32 %v360_v39, %v760_v8  ;;  %v393_v45 = vmul.f32 %v506_v38, %v392_v31  ;;  %v404_v49 = vmul.f32 0.5, %v403_v40  ;;  %vm399_vm8 = vmor %vm397_vm7, %vm398_vm1  ;;  %vm417_vm10 = vweird.f32 %v824_v34 }
 0x221   :  { %v436_v43 = vmul.f32 %v796_v52, %v424_v41  ;;  %v384_v48 = vmul.f32 0.5, %v383_v44 }
 0x222   :  { %v434_v46 = vmul.f32 %v796_v52, %v422_v42  ;;  %v394_v51 = vmul.f32 0.5, %v393_v45  ;;  %v405_v54 = vsub.f32 1.5, %v404_v49 }
 0x223   :  { %v448_v50 = vadd.f32 %v801_v56, %v436_v43  ;;  %v385_v53 = vsub.f32 1.5, %v384_v48 }
 0x224   :  { %v508_v35 = vpop.eup %507  ;;  %v446_v7 = vadd.f32 %v801_v56, %v434_v46  ;;  %v395_v8 = vsub.f32 1.5, %v394_v51  ;;  %v406_v59 = vmul.f32 %v502_v33, %v405_v54 }
 0x225   :  { %457 = vst.msk [vmem:[#allocation7 + $0xc] sm:$0xf] %vm453_vm6, %v448_v50  ;;  %v412_v57 = vmul.f32 %v508_v35, %v824_v34  ;;  %v386_v58 = vmul.f32 %v504_v36, %v385_v53  ;;  %vm418_vm9 = vweird.f32 %v508_v35 }
 0x226   :  { %455 = vst.msk [vmem:[#allocation7 + $0x4] sm:$0xf] %vm453_vm6, %v446_v7  ;;  %v396_v61 = vmul.f32 %v506_v38, %v395_v8  ;;  %v410_v4 = vsel %vm409_vm4, %v502_v33, %v406_v59  ;;  %vm419_vm11 = vmor %vm417_vm10, %vm418_vm9 }
 0x227   :  { %v413_v62 = vmul.f32 %v508_v35, %v412_v57  ;;  %v390_v3 = vsel %vm389_vm5, %v504_v36, %v386_v58  ;;  %v427_v1 = vmul.f32 %v410_v4, %v771_v17 }
 0x228   :  { %v425_v60 = vmul.f32 %v390_v3, %v773_v19  ;;  %v400_v0 = vsel %vm399_vm8, %v506_v38, %v396_v61 }
 0x229   :  { %v414_v2 = vmul.f32 0.5, %v413_v62  ;;  %v426_v5 = vmul.f32 %v400_v0, %v775_v20  ;;  %v439_v47 = vmul.f32 %v796_v52, %v427_v1 }
 0x22a   :  { %v437_v10 = vmul.f32 %v796_v52, %v425_v60 }
 0x22b   :  { %v415_v11 = vsub.f32 1.5, %v414_v2  ;;  %v438_v13 = vmul.f32 %v796_v52, %v426_v5  ;;  %v451_v6 = vadd.f32 %v801_v56, %v439_v47 }
 0x22c   :  { %v449_v9 = vadd.f32 %v801_v56, %v437_v10 }
 0x22d   :  { %v416_v12 = vmul.f32 %v508_v35, %v415_v11  ;;  %v450_v17 = vadd.f32 %v801_v56, %v438_v13  ;;  %460 = vst.msk [vmem:[#allocation7 + $0x18] sm:$0xf] %vm453_vm6, %v451_v6 }
 0x22e   :  { %458 = vst.msk [vmem:[#allocation7 + $0x10] sm:$0xf] %vm453_vm6, %v449_v9 }
 0x22f   :  { %v420_v19 = vsel %vm419_vm11, %v508_v35, %v416_v12  ;;  %459 = vst.msk [vmem:[#allocation7 + $0x14] sm:$0xf] %vm453_vm6, %v450_v17 }
 0x230   :  { %v428_v20 = vmul.f32 %v420_v19, %v787_v21 }
 0x232   :  { %v440_v14 = vmul.f32 %v796_v52, %v428_v20 }
 0x234   :  { %v452_v15 = vadd.f32 %v801_v56, %v440_v14 }
 0x236   :  { %461 = vst.msk [vmem:[#allocation7 + $0x1c] sm:$0xf] %vm453_vm6, %v452_v15 }
 0x237   :  { %474 = dma.vmem_to_hbm [thread:$0]  %s467_s25, 512, %s469_s28, [#allocation4], %s588_s20, %s588_s20, %s589_s21  }
 0x238   :  { %585 = dma.done.wait [#allocation4], 512  }
 0x239   :  { %586 = vsyncadd [#allocation4], 4294966784 }
 0x23a   :  { %479 = vsyncpa [#allocation3], 1 }
 0x23b   :  { %480 = vsyncpa [#allocation6], 1 }
 0x23c   :  { %481 = vsyncpa [#allocation4], 1 }

</bundles_post_ra>
